<compile_context>
chip_gen: v5e
topology: v5e:2x2
jax: 0.10.0
libtpu: 0.0.40
codegen_flags: <defaults>
</compile_context>

<pallas_src>
import jax
import jax.numpy as jnp
from jax.experimental import pallas as pl
from jax.experimental.pallas import tpu as pltpu


# ---------------------------------------------------------------------------
# Kernels
# ---------------------------------------------------------------------------

def _copy_kernel(x_ref, o_ref):
    # Chomp is done entirely by the BlockSpecs: pure streaming copy.
    o_ref[...] = x_ref[...]


def _slice_kernel(x_ref, o_ref):
    # Short-sequence fallback: read full (tiny) length, keep the leading prefix.
    o_ref[...] = x_ref[:, : o_ref.shape[-1]]


# ---------------------------------------------------------------------------
# Wrapper
# ---------------------------------------------------------------------------

# Per-block buffer budget.  Input + output are each double-buffered, so peak
# VMEM ~ 4x this: comfortably inside the 32 MiB scoped default and v7x's 64 MiB.
_VMEM_BLOCK_BUDGET = 4 * 1024 * 1024


def _sublane_multiple(itemsize: int) -> int:
    # f32 -> 8, bf16/f16 -> 16, int8/fp8 -> 32 (native packed-tile sublane counts).
    return max(8, 32 // max(itemsize, 1))


def _row_tile(n_rows: int, row_bytes: int, itemsize: int,
              budget: int = _VMEM_BLOCK_BUDGET) -> int:
    """Sublane-dense row tile: multiple of the packed sublane count, or full extent."""
    max_rows = max(1, budget // max(row_bytes, 1))
    if n_rows <= max_rows:
        return n_rows                                   # full extent is always legal
    sub = _sublane_multiple(itemsize)
    return max(sub, (max_rows // sub) * sub)


def chomp1d(x: jax.Array, chomp_size: int) -> jax.Array:
    """Pallas implementation of Chomp1d.forward: x[:, :, :-chomp_size]."""
    assert chomp_size > 0, "chomp_size must be positive (matches PyTorch slice semantics)"
    n, c, l = x.shape
    l_out = l - chomp_size
    assert l_out > 0, "chomp_size must be smaller than the sequence length"

    r = n * c
    x2 = x.reshape(r, l)                                # merging leading dims: free reshape
    itemsize = jnp.dtype(x.dtype).itemsize

    if l_out >= 128:
        # Lane-dense path: chomp via the input BlockSpec.  Only the kept prefix
        # (plus at most one ragged tail tile) is read; OOB output writes of the
        # ragged tile are dropped, and the matching input reads land inside the
        # (still allocated) chomped region or are padded — never written back.
        tl = min(2048, (l_out // 128) * 128)            # multiple of 128 lanes
        tr = _row_tile(r, tl * itemsize, itemsize)
        grid = (pl.cdiv(r, tr), pl.cdiv(l_out, tl))
        in_specs = [pl.BlockSpec((tr, tl), lambda i, j: (i, j))]
        out_specs = pl.BlockSpec((tr, tl), lambda i, j: (i, j))
        kernel = _copy_kernel
        bytes_accessed = 2 * r * l_out * itemsize
    else:
        # Short-sequence path: full-extent length blocks (always legal shapes),
        # slice in-register.
        tr = _row_tile(r, l * itemsize, itemsize)
        grid = (pl.cdiv(r, tr),)
        in_specs = [pl.BlockSpec((tr, l), lambda i: (i, 0))]
        out_specs = pl.BlockSpec((tr, l_out), lambda i: (i, 0))
        kernel = _slice_kernel
        bytes_accessed = r * (l + l_out) * itemsize

    out2 = pl.pallas_call(
        kernel,
        out_shape=jax.ShapeDtypeStruct((r, l_out), x.dtype),
        grid=grid,
        in_specs=in_specs,
        out_specs=out_specs,
        compiler_params=pltpu.CompilerParams(
            dimension_semantics=("parallel",) * len(grid)
        ),
        cost_estimate=pl.CostEstimate(
            flops=0, transcendentals=0, bytes_accessed=int(bytes_accessed)
        ),
    )(x2)
    return out2.reshape(n, c, l_out)


if __name__ == "__main__":
    key = jax.random.PRNGKey(0)
    k1, k2 = jax.random.split(key)

    # Small shape consistent with a TCN activation: (batch, channels, length).
    N, C, L = 2, 4, 16
    chomp = 4                               # e.g. (kernel_size - 1) * dilation removed
    x = jax.random.normal(k1, (N, C, L), dtype=jnp.float32)

    y = jax.block_until_ready(chomp1d(x, chomp))
    ref = x[:, :, :-chomp]
    assert y.shape == (N, C, L - chomp)
    assert jnp.array_equal(y, ref)

    # Longer sequence exercising the lane-dense, BlockSpec-chomped path
    # (including a ragged final length tile: l_out = 290, tile = 256).
    N2, C2, L2 = 2, 3, 300
    chomp2 = 10
    x2 = jax.random.normal(k2, (N2, C2, L2), dtype=jnp.float32)
    y2 = jax.block_until_ready(chomp1d(x2, chomp2))
    ref2 = x2[:, :, :-chomp2]
    assert y2.shape == (N2, C2, L2 - chomp2)
    assert jnp.array_equal(y2, ref2)

    print("KERNEL_OK")
</pallas_src>

<mosaic_0001>
module attributes {stable_mosaic.version = 11 : i64} {
  func.func @_slice_kernel(%arg0: i32, %arg1: memref<8x16xf32, #tpu.memory_space<vmem>>, %arg2: memref<8x12xf32, #tpu.memory_space<vmem>>) attributes {dimension_semantics = [#tpu.dimension_semantics<parallel>], iteration_bounds = array<i64: 1>, scalar_prefetch = 0 : i64, scratch_operands = 0 : i64, tpu.core_type = #tpu.core_type<tc>, window_params = [{transform_indices = @transform_0, window_bounds = array<i64: 8, 16>}, {transform_indices = @transform_1, window_bounds = array<i64: 8, 12>}]} {
    %c0 = arith.constant 0 : index
    %c0_0 = arith.constant 0 : index
    %0 = vector.load %arg1[%c0, %c0_0] : memref<8x16xf32, #tpu.memory_space<vmem>>, vector<8x12xf32>
    %c0_1 = arith.constant 0 : index
    %c0_2 = arith.constant 0 : index
    %1 = vector.load %arg2[%c0_1, %c0_2] : memref<8x12xf32, #tpu.memory_space<vmem>>, vector<8x12xf32>
    tpu.vector_store %arg2[%c0_1, %c0_2], %0 {strides = array<i32>} : memref<8x12xf32, #tpu.memory_space<vmem>>, vector<8x12xf32>,
    return
  }
  func.func @transform_0(%arg0: i32) -> (i32, i32) {
    %c0_i32 = arith.constant 0 : i32
    %c0_i32_0 = arith.constant 0 : i32
    return %arg0, %c0_i32 : i32, i32
  }
  func.func @transform_1(%arg0: i32) -> (i32, i32) {
    %c0_i32 = arith.constant 0 : i32
    %c0_i32_0 = arith.constant 0 : i32
    return %arg0, %c0_i32 : i32, i32
  }
}

</mosaic_0001>

<bundles_post_ra>
// kernel: tpu_custom_call.1
= control target key start
LH: loop header
LB: loop body
LE: loop exit
PB: predicated region body
PF: predicated region fallthrough
CT: control target
= control target key end

     0   :  { %6 = vsyncpa [#allocation3], 0  ;;  %s115_s0 = inlined_call_operand.hbm [shape: f32[8,16], index: 0, kind: input, shape index: {}]   ;;  %s116_s1 = inlined_call_operand.hbm [shape: f32[8,12], index: 1, kind: output, shape index: {}]  }
   0x1   :  { %7 = vsyncpa [#allocation4], 0  ;;  %s13_s8 = sshll.u32 %s115_s0, 4  ;;  %s97_s9 = smov [#allocation2]   ;;  %s14_s8 = int_to_ptr.hbm [resolvable:$true] %s13_s8 }
   0x2   :  { %s15_s10 = sshll.u32 %s97_s9, 4  ;;  %s16_s10 = int_to_ptr.vmem [resolvable:$true] %s15_s10 }
   0x3   :  { %18 = dma.hbm_to_vmem [thread:$0]  %s14_s8, 128, %s16_s10, [#allocation3]  }
   0x4   :  { %93 = dma.done.wait [#allocation3], 128  }
   0x5   :  { %94 = vsyncadd [#allocation3], 4294967168  ;;  %s98_s11 = smov [#allocation5]   ;;  %s33_s15 = sshll.u32 %s116_s1, 4  ;;  %vm24_vm0 = vcmask 97280   ;;  %v23_v0 = vld [vmem:[#allocation2] sm:$0xff]  ;;  %s34_s15 = int_to_ptr.hbm [resolvable:$true] %s33_s15 }
   0x6   :  { %s31_s12 = sshll.u32 %s98_s11, 4  ;;  %25 = vst.msk [vmem:[#allocation5] sm:$0xff] %vm24_vm0, %v23_v0  ;;  %s32_s12 = int_to_ptr.vmem [resolvable:$true] %s31_s12 }
   0x7   :  { %36 = dma.vmem_to_hbm [thread:$0]  %s32_s12, 128, %s34_s15, [#allocation4]  }
   0x8   :  { %95 = dma.done.wait [#allocation4], 128  }
   0x9   :  { %96 = vsyncadd [#allocation4], 4294967168 }
   0xa   :  { %41 = vsyncpa [#allocation3], 1 }
   0xb   :  { %42 = vsyncpa [#allocation4], 1 }

</bundles_post_ra>
